<compile_context>
chip_gen: v5e
topology: v5e:2x2
jax: 0.10.0
libtpu: 0.0.40
codegen_flags: <defaults>
</compile_context>

<pallas_src>
import functools

import jax
import jax.numpy as jnp
from jax import lax
from jax.experimental import pallas as pl
from jax.experimental.pallas import tpu as pltpu

_BN_EPS = 1e-5
_VMEM_LIMIT = 32 * 1024 * 1024


def _round_up(x, m):
    return ((x + m - 1) // m) * m


# ---------------------------------------------------------------------------
# kernel helpers
# ---------------------------------------------------------------------------
def _mm(x, w_ref):
    # Cast activations to the (possibly bf16) weight dtype; accumulate f32 on MXU.
    return jnp.dot(x.astype(w_ref.dtype), w_ref[...],
                   preferred_element_type=jnp.float32)


def _tail(xs, act, w2s_ref, w2a_ref, b2_ref, w3_ref, b3_ref, w4row_ref, b4_ref):
    # fc2 on the implicit concat([xs, action]) via split matmul.
    h2 = jnp.maximum(_mm(xs, w2s_ref) + _mm(act, w2a_ref) + b2_ref[...], 0.0)
    h3 = jnp.maximum(_mm(h2, w3_ref) + b3_ref[...], 0.0)
    # fc4: N=1 matmul as VPU multiply + lane reduce.
    return jnp.sum(h3 * w4row_ref[...], axis=-1, keepdims=True) + b4_ref[...]


# ---------------------------------------------------------------------------
# kernels
# ---------------------------------------------------------------------------
def _fused_kernel(packed_ref, w1_ref, g1_ref, be1_ref,
                  w2s_ref, w2a_ref, b2_ref, w3_ref, b3_ref,
                  w4row_ref, b4_ref, out_ref, *, s_pad):
    st = packed_ref[:, :s_pad]
    act = packed_ref[:, s_pad:]
    # fc1 without bias (cancels exactly under batch-stat BN).
    h1 = _mm(st, w1_ref)                                     # (B, fc1) f32
    inv_n = 1.0 / h1.shape[0]
    mean = jnp.sum(h1, axis=0, keepdims=True) * inv_n
    c = h1 - mean                                            # centered -> safe variance
    var = jnp.sum(c * c, axis=0, keepdims=True) * inv_n      # biased (training BN)
    scale = g1_ref[...] * lax.rsqrt(var + _BN_EPS)
    xs = jnp.maximum(c * scale + be1_ref[...], 0.0)
    out_ref[...] = _tail(xs, act, w2s_ref, w2a_ref, b2_ref,
                         w3_ref, b3_ref, w4row_ref, b4_ref)


def _stats_kernel(packed_ref, w1_ref, g1_ref, be1_ref,
                  w1s_ref, shift_ref, sum_sc, sq_sc, *, s_pad, inv_n, cd):
    # Pass 1: global (whole-batch) BN statistics of fc1, finalized in-kernel.
    @pl.when(pl.program_id(0) == 0)
    def _():
        sum_sc[...] = jnp.zeros_like(sum_sc)
        sq_sc[...] = jnp.zeros_like(sq_sc)

    h1 = jnp.dot(packed_ref[:, :s_pad].astype(cd), w1_ref[...].astype(cd),
                 preferred_element_type=jnp.float32)
    sum_sc[...] += jnp.sum(h1, axis=0, keepdims=True)
    sq_sc[...] += jnp.sum(h1 * h1, axis=0, keepdims=True)

    @pl.when(pl.program_id(0) == pl.num_programs(0) - 1)
    def _():
        mean = sum_sc[...] * inv_n
        var = jnp.maximum(sq_sc[...] * inv_n - mean * mean, 0.0)
        scale = g1_ref[...] * lax.rsqrt(var + _BN_EPS)
        shift_ref[...] = be1_ref[...] - mean * scale
        # Fold the BN scale into the fc1 weight (f32 multiply, then cast).
        w1s_ref[...] = (w1_ref[...] * scale).astype(cd)


def _apply_kernel(packed_ref, w1s_ref, shift_ref,
                  w2s_ref, w2a_ref, b2_ref, w3_ref, b3_ref,
                  w4row_ref, b4_ref, out_ref, *, s_pad):
    # Pass 2: BN scale is pre-folded into w1s; only the shift remains.
    h1 = _mm(packed_ref[:, :s_pad], w1s_ref)
    xs = jnp.maximum(h1 + shift_ref[...], 0.0)
    out_ref[...] = _tail(xs, packed_ref[:, s_pad:], w2s_ref, w2a_ref, b2_ref,
                         w3_ref, b3_ref, w4row_ref, b4_ref)


# ---------------------------------------------------------------------------
# wrapper
# ---------------------------------------------------------------------------
def critic_forward(state, action, params, *, tile_b=2048, fused_max_b=4096,
                   compute_dtype=jnp.bfloat16):
    """DDPG Critic forward: (state, action) -> Q, as Pallas TPU kernels."""
    B, S = state.shape
    A = action.shape[1]
    fc1 = params["w1"].shape[1]
    fc2 = params["w2s"].shape[1]
    fc3 = params["w3"].shape[1]
    cd = compute_dtype

    s_pad = max(_round_up(S, 8), 8)
    a_pad = max(_round_up(A, 8), 8)
    c_cols = s_pad + a_pad

    # Zero-pad feature columns (and the matching weight rows), then pack
    # [state | action] into a single HBM array -> one input DMA per grid step.
    w1 = jnp.zeros((s_pad, fc1), jnp.float32).at[:S].set(params["w1"])
    w2a = jnp.zeros((a_pad, fc2), jnp.float32).at[:A].set(params["w2a"]).astype(cd)
    packed = jnp.concatenate(
        [jnp.pad(state.astype(jnp.float32), ((0, 0), (0, s_pad - S))),
         jnp.pad(action.astype(jnp.float32), ((0, 0), (0, a_pad - A)))], axis=1)

    g1, be1 = params["g1"], params["be1"]
    w2s = params["w2s"].astype(cd)
    b2, b3 = params["b2"], params["b3"]
    w3 = params["w3"].astype(cd)
    w4row = params["w4"].reshape(1, fc3).astype(jnp.float32)  # (1, fc3) VPU reduce
    b4 = params["b4"].reshape(1, 1).astype(jnp.float32)

    if B <= fused_max_b:
        # ---- small/medium batch: one fused launch, whole batch VMEM-resident ----
        vmem = pl.BlockSpec(memory_space=pltpu.MemorySpace.VMEM)
        inputs = (packed, w1.astype(cd), g1, be1, w2s, w2a, b2, w3, b3, w4row, b4)
        return pl.pallas_call(
            functools.partial(_fused_kernel, s_pad=s_pad),
            out_shape=jax.ShapeDtypeStruct((B, 1), jnp.float32),
            in_specs=[vmem] * len(inputs),
            out_specs=vmem,
            compiler_params=pltpu.CompilerParams(vmem_limit_bytes=_VMEM_LIMIT),
        )(*inputs)

    # ---- large batch: zero-row pad to a multiple of the tile, then two passes ----
    tb = max(_round_up(min(tile_b, B), 8), 8)
    b_pad = _round_up(B, tb)
    if b_pad != B:
        packed = jnp.pad(packed, ((0, b_pad - B), (0, 0)))   # zero rows -> stats exact
    n_tiles = b_pad // tb
    rep = lambda i: (0, 0)            # weights / biases stay VMEM-resident across grid

    # Pass 1: global BN stats; last step emits scale-folded W1 + shift directly.
    w1s, shift = pl.pallas_call(
        functools.partial(_stats_kernel, s_pad=s_pad, inv_n=1.0 / B, cd=cd),
        out_shape=(jax.ShapeDtypeStruct((s_pad, fc1), cd),
                   jax.ShapeDtypeStruct((1, fc1), jnp.float32)),
        grid=(n_tiles,),
        in_specs=[pl.BlockSpec((tb, c_cols), lambda i: (i, 0)),
                  pl.BlockSpec((s_pad, fc1), rep),
                  pl.BlockSpec((1, fc1), rep),
                  pl.BlockSpec((1, fc1), rep)],
        out_specs=(pl.BlockSpec((s_pad, fc1), rep),
                   pl.BlockSpec((1, fc1), rep)),
        scratch_shapes=[pltpu.VMEM((1, fc1), jnp.float32),
                        pltpu.VMEM((1, fc1), jnp.float32)],
        compiler_params=pltpu.CompilerParams(
            dimension_semantics=("arbitrary",), vmem_limit_bytes=_VMEM_LIMIT),
    )(packed, w1, g1, be1)

    # Pass 2: tiled apply, batch axis parallel (megacore-friendly on v7x).
    q = pl.pallas_call(
        functools.partial(_apply_kernel, s_pad=s_pad),
        out_shape=jax.ShapeDtypeStruct((b_pad, 1), jnp.float32),
        grid=(n_tiles,),
        in_specs=[pl.BlockSpec((tb, c_cols), lambda i: (i, 0)),
                  pl.BlockSpec((s_pad, fc1), rep),
                  pl.BlockSpec((1, fc1), rep),
                  pl.BlockSpec((fc1, fc2), rep),
                  pl.BlockSpec((a_pad, fc2), rep),
                  pl.BlockSpec((1, fc2), rep),
                  pl.BlockSpec((fc2, fc3), rep),
                  pl.BlockSpec((1, fc3), rep),
                  pl.BlockSpec((1, fc3), rep),
                  pl.BlockSpec((1, 1), rep)],
        out_specs=pl.BlockSpec((tb, 1), lambda i: (i, 0)),
        compiler_params=pltpu.CompilerParams(
            dimension_semantics=("parallel",), vmem_limit_bytes=_VMEM_LIMIT),
    )(packed, w1s, shift, w2s, w2a, b2, w3, b3, w4row, b4)

    return q[:B] if b_pad != B else q


# ---------------------------------------------------------------------------
# parameters + pure-JAX reference
# ---------------------------------------------------------------------------
def init_params(key, state_size, action_size,
                fc1_units=128, fc2_units=64, fc3_units=32):
    """Deterministic synthetic init mirroring the module's layer shapes."""
    ks = jax.random.split(key, 8)

    def unif(k, shape, lim):
        return jax.random.uniform(k, shape, jnp.float32, -lim, lim)

    w1 = unif(ks[0], (state_size, fc1_units), 1.0 / jnp.sqrt(fc1_units))
    b1 = unif(ks[1], (1, fc1_units), 1.0 / jnp.sqrt(state_size))
    w2 = unif(ks[2], (fc1_units + action_size, fc2_units),
              1.0 / jnp.sqrt(fc2_units))
    b2 = unif(ks[3], (1, fc2_units), 1.0 / jnp.sqrt(fc1_units + action_size))
    w3 = unif(ks[4], (fc2_units, fc3_units), 1.0 / jnp.sqrt(fc3_units))
    b3 = unif(ks[5], (1, fc3_units), 1.0 / jnp.sqrt(fc2_units))
    w4 = unif(ks[6], (fc3_units, 1), 0.003)
    b4 = unif(ks[7], (1, 1), 1.0 / jnp.sqrt(fc3_units))

    return {
        "w1": w1, "b1": b1,                              # b1 only in the reference
        "g1": jnp.ones((1, fc1_units), jnp.float32),     # BatchNorm1d default affine
        "be1": jnp.zeros((1, fc1_units), jnp.float32),
        "w2s": w2[:fc1_units], "w2a": w2[fc1_units:], "b2": b2,
        "w3": w3, "b3": b3,
        "w4": w4, "b4": b4,
    }


def critic_ref(state, action, p):
    """Pure-JAX reference (mirrors the PyTorch forward, incl. the fc1 bias)."""
    h1 = state @ p["w1"] + p["b1"]
    mean = jnp.mean(h1, axis=0, keepdims=True)
    var = jnp.mean((h1 - mean) ** 2, axis=0, keepdims=True)
    xs = jnp.maximum((h1 - mean) / jnp.sqrt(var + _BN_EPS) * p["g1"] + p["be1"], 0.0)
    h2 = jnp.maximum(xs @ p["w2s"] + action @ p["w2a"] + p["b2"], 0.0)
    h3 = jnp.maximum(h2 @ p["w3"] + p["b3"], 0.0)
    return h3 @ p["w4"] + p["b4"]


# ---------------------------------------------------------------------------
# demo / correctness check
# ---------------------------------------------------------------------------
if __name__ == "__main__":
    STATE_SIZE, ACTION_SIZE = 16, 4
    key = jax.random.PRNGKey(0)
    k_s, k_a, k_p = jax.random.split(key, 3)
    params = init_params(k_p, STATE_SIZE, ACTION_SIZE)

    # Small batch -> single fused launch (everything VMEM-resident).
    B = 8
    state = jax.random.normal(k_s, (B, STATE_SIZE), jnp.float32)
    action = jax.random.normal(k_a, (B, ACTION_SIZE), jnp.float32)
    q_ref = critic_ref(state, action, params)

    q32 = critic_forward(state, action, params, compute_dtype=jnp.float32)
    jax.block_until_ready(q32)
    assert q32.shape == (B, 1)
    assert jnp.allclose(q32, q_ref, atol=1e-4, rtol=1e-3), "fused f32 mismatch"

    qbf = critic_forward(state, action, params)          # default bf16 compute
    jax.block_until_ready(qbf)
    assert jnp.allclose(qbf, q_ref, atol=1e-1, rtol=1e-1), "fused bf16 mismatch"

    # Larger, non-divisible batch -> two-pass gridded path (padding + global BN).
    BB = 300
    state_b = jax.random.normal(k_s, (BB, STATE_SIZE), jnp.float32)
    action_b = jax.random.normal(k_a, (BB, ACTION_SIZE), jnp.float32)
    q_b_ref = critic_ref(state_b, action_b, params)

    q_b32 = critic_forward(state_b, action_b, params, tile_b=128, fused_max_b=64,
                           compute_dtype=jnp.float32)
    jax.block_until_ready(q_b32)
    assert q_b32.shape == (BB, 1)
    assert jnp.allclose(q_b32, q_b_ref, atol=1e-4, rtol=1e-3), "gridded f32 mismatch"

    q_b16 = critic_forward(state_b, action_b, params, tile_b=128, fused_max_b=64)
    jax.block_until_ready(q_b16)
    assert jnp.allclose(q_b16, q_b_ref, atol=1e-1, rtol=1e-1), "gridded bf16 mismatch"

    print("KERNEL_OK")
</pallas_src>

<mosaic_0001>
module attributes {stable_mosaic.version = 11 : i64} {
  func.func @_fused_kernel(%arg0: memref<8x24xf32, #tpu.memory_space<vmem>>, %arg1: memref<16x128xf32, #tpu.memory_space<vmem>>, %arg2: memref<1x128xf32, #tpu.memory_space<vmem>>, %arg3: memref<1x128xf32, #tpu.memory_space<vmem>>, %arg4: memref<128x64xf32, #tpu.memory_space<vmem>>, %arg5: memref<8x64xf32, #tpu.memory_space<vmem>>, %arg6: memref<1x64xf32, #tpu.memory_space<vmem>>, %arg7: memref<64x32xf32, #tpu.memory_space<vmem>>, %arg8: memref<1x32xf32, #tpu.memory_space<vmem>>, %arg9: memref<1x32xf32, #tpu.memory_space<vmem>>, %arg10: memref<1x1xf32, #tpu.memory_space<vmem>>, %arg11: memref<8x1xf32, #tpu.memory_space<vmem>>) attributes {dimension_semantics = [], scalar_prefetch = 0 : i64, scratch_operands = 0 : i64, tpu.core_type = #tpu.core_type<tc>} {
    %c0 = arith.constant 0 : index
    %c0_0 = arith.constant 0 : index
    %0 = vector.load %arg0[%c0, %c0_0] : memref<8x24xf32, #tpu.memory_space<vmem>>, vector<8x16xf32>
    %c0_1 = arith.constant 0 : index
    %c16 = arith.constant 16 : index
    %1 = vector.load %arg0[%c0_1, %c16] : memref<8x24xf32, #tpu.memory_space<vmem>>, vector<8x8xf32>
    %c0_2 = arith.constant 0 : index
    %c0_3 = arith.constant 0 : index
    %2 = vector.load %arg1[%c0_2, %c0_3] : memref<16x128xf32, #tpu.memory_space<vmem>>, vector<16x128xf32>
    %cst = arith.constant dense<0.000000e+00> : vector<8x128xf32>
    %3 = tpu.matmul %0, %2, %cst {dimension_numbers = #tpu.dot_dimension_numbers<[1], [0], [0], [1], [0, 0, 1, 1], [], []>} : vector<8x16xf32>, vector<16x128xf32>, vector<8x128xf32> -> vector<8x128xf32>
    %cst_4 = arith.constant dense<0.000000e+00> : vector<128xf32>
    %4 = vector.multi_reduction <add>, %3, %cst_4 [0] : vector<8x128xf32> to vector<128xf32>
    %5 = vector.shape_cast %4 : vector<128xf32> to vector<1x128xf32>
    %cst_5 = arith.constant 1.250000e-01 : f32
    %6 = vector.broadcast %cst_5 : f32 to vector<1x128xf32>
    %7 = arith.mulf %5, %6 : vector<1x128xf32>
    %8 = vector.broadcast %7 : vector<1x128xf32> to vector<8x128xf32>
    %9 = arith.subf %3, %8 : vector<8x128xf32>
    %10 = arith.mulf %9, %9 : vector<8x128xf32>
    %cst_6 = arith.constant dense<0.000000e+00> : vector<128xf32>
    %11 = vector.multi_reduction <add>, %10, %cst_6 [0] : vector<8x128xf32> to vector<128xf32>
    %12 = vector.shape_cast %11 : vector<128xf32> to vector<1x128xf32>
    %cst_7 = arith.constant 1.250000e-01 : f32
    %13 = vector.broadcast %cst_7 : f32 to vector<1x128xf32>
    %14 = arith.mulf %12, %13 : vector<1x128xf32>
    %c0_8 = arith.constant 0 : index
    %c0_9 = arith.constant 0 : index
    %15 = vector.load %arg2[%c0_8, %c0_9] : memref<1x128xf32, #tpu.memory_space<vmem>>, vector<1x128xf32>
    %cst_10 = arith.constant 9.99999974E-6 : f32
    %16 = vector.broadcast %cst_10 : f32 to vector<1x128xf32>
    %17 = arith.addf %14, %16 : vector<1x128xf32>
    %18 = math.rsqrt %17 : vector<1x128xf32>
    %19 = arith.mulf %15, %18 : vector<1x128xf32>
    %20 = vector.broadcast %19 : vector<1x128xf32> to vector<8x128xf32>
    %21 = arith.mulf %9, %20 : vector<8x128xf32>
    %c0_11 = arith.constant 0 : index
    %c0_12 = arith.constant 0 : index
    %22 = vector.load %arg3[%c0_11, %c0_12] : memref<1x128xf32, #tpu.memory_space<vmem>>, vector<1x128xf32>
    %23 = vector.broadcast %22 : vector<1x128xf32> to vector<8x128xf32>
    %24 = arith.addf %21, %23 : vector<8x128xf32>
    %cst_13 = arith.constant 0.000000e+00 : f32
    %25 = vector.broadcast %cst_13 : f32 to vector<8x128xf32>
    %26 = arith.maximumf %24, %25 : vector<8x128xf32>
    %c0_14 = arith.constant 0 : index
    %c0_15 = arith.constant 0 : index
    %27 = vector.load %arg4[%c0_14, %c0_15] : memref<128x64xf32, #tpu.memory_space<vmem>>, vector<128x64xf32>
    %cst_16 = arith.constant dense<0.000000e+00> : vector<8x64xf32>
    %28 = tpu.matmul %26, %27, %cst_16 {dimension_numbers = #tpu.dot_dimension_numbers<[1], [0], [0], [1], [0, 0, 1, 1], [], []>} : vector<8x128xf32>, vector<128x64xf32>, vector<8x64xf32> -> vector<8x64xf32>
    %c0_17 = arith.constant 0 : index
    %c0_18 = arith.constant 0 : index
    %29 = vector.load %arg5[%c0_17, %c0_18] : memref<8x64xf32, #tpu.memory_space<vmem>>, vector<8x64xf32>
    %cst_19 = arith.constant dense<0.000000e+00> : vector<8x64xf32>
    %30 = tpu.matmul %1, %29, %cst_19 {dimension_numbers = #tpu.dot_dimension_numbers<[1], [0], [0], [1], [0, 0, 1, 1], [], []>} : vector<8x8xf32>, vector<8x64xf32>, vector<8x64xf32> -> vector<8x64xf32>
    %31 = arith.addf %28, %30 : vector<8x64xf32>
    %c0_20 = arith.constant 0 : index
    %c0_21 = arith.constant 0 : index
    %32 = vector.load %arg6[%c0_20, %c0_21] : memref<1x64xf32, #tpu.memory_space<vmem>>, vector<1x64xf32>
    %33 = vector.broadcast %32 : vector<1x64xf32> to vector<8x64xf32>
    %34 = arith.addf %31, %33 : vector<8x64xf32>
    %cst_22 = arith.constant 0.000000e+00 : f32
    %35 = vector.broadcast %cst_22 : f32 to vector<8x64xf32>
    %36 = arith.maximumf %34, %35 : vector<8x64xf32>
    %c0_23 = arith.constant 0 : index
    %c0_24 = arith.constant 0 : index
    %37 = vector.load %arg7[%c0_23, %c0_24] : memref<64x32xf32, #tpu.memory_space<vmem>>, vector<64x32xf32>
    %cst_25 = arith.constant dense<0.000000e+00> : vector<8x32xf32>
    %38 = tpu.matmul %36, %37, %cst_25 {dimension_numbers = #tpu.dot_dimension_numbers<[1], [0], [0], [1], [0, 0, 1, 1], [], []>} : vector<8x64xf32>, vector<64x32xf32>, vector<8x32xf32> -> vector<8x32xf32>
    %c0_26 = arith.constant 0 : index
    %c0_27 = arith.constant 0 : index
    %39 = vector.load %arg8[%c0_26, %c0_27] : memref<1x32xf32, #tpu.memory_space<vmem>>, vector<1x32xf32>
    %40 = vector.broadcast %39 : vector<1x32xf32> to vector<8x32xf32>
    %41 = arith.addf %38, %40 : vector<8x32xf32>
    %cst_28 = arith.constant 0.000000e+00 : f32
    %42 = vector.broadcast %cst_28 : f32 to vector<8x32xf32>
    %43 = arith.maximumf %41, %42 : vector<8x32xf32>
    %c0_29 = arith.constant 0 : index
    %c0_30 = arith.constant 0 : index
    %44 = vector.load %arg9[%c0_29, %c0_30] : memref<1x32xf32, #tpu.memory_space<vmem>>, vector<1x32xf32>
    %45 = vector.broadcast %44 : vector<1x32xf32> to vector<8x32xf32>
    %46 = arith.mulf %43, %45 : vector<8x32xf32>
    %cst_31 = arith.constant dense<0.000000e+00> : vector<8xf32>
    %47 = vector.multi_reduction <add>, %46, %cst_31 [1] : vector<8x32xf32> to vector<8xf32>
    %48 = vector.shape_cast %47 : vector<8xf32> to vector<8x1xf32>
    %c0_32 = arith.constant 0 : index
    %c0_33 = arith.constant 0 : index
    %49 = vector.load %arg10[%c0_32, %c0_33] : memref<1x1xf32, #tpu.memory_space<vmem>>, vector<1x1xf32>
    %50 = vector.broadcast %49 : vector<1x1xf32> to vector<8x1xf32>
    %51 = arith.addf %48, %50 : vector<8x1xf32>
    %c0_34 = arith.constant 0 : index
    %c0_35 = arith.constant 0 : index
    %52 = vector.load %arg11[%c0_34, %c0_35] : memref<8x1xf32, #tpu.memory_space<vmem>>, vector<8x1xf32>
    tpu.vector_store %arg11[%c0_34, %c0_35], %51 {strides = array<i32>} : memref<8x1xf32, #tpu.memory_space<vmem>>, vector<8x1xf32>,
    return
  }
}

</mosaic_0001>

<bundles_post_ra>
// kernel: tpu_custom_call.1
= control target key start
LH: loop header
LB: loop body
LE: loop exit
PB: predicated region body
PF: predicated region fallthrough
CT: control target
= control target key end

     0   :  { %vm43_vm0 = vcmask 130048   ;;  %s242_s23 = smov 112   ;;  %vm125_vm1 = vcmask 64512   ;;  %vm186_vm5 = vcmask 523264   ;;  %vm216_vm6 = vcmask 261120   ;;  %s408_s1 = inlined_call_operand.vmem [shape: f32[16,128], index: 1, kind: input, shape index: {}]   ;;  %s409_s0 = inlined_call_operand.vmem [shape: f32[8,24], index: 0, kind: input, shape index: {}]   ;;  %s410_s3 = inlined_call_operand.vmem [shape: f32[1,128], index: 3, kind: input, shape index: {}]   ;;  %s411_s4 = inlined_call_operand.vmem [shape: f32[128,64], index: 4, kind: input, shape index: {}]   ;;  %s412_s5 = inlined_call_operand.vmem [shape: f32[8,64], index: 5, kind: input, shape index: {}]   ;;  %s413_s7 = inlined_call_operand.vmem [shape: f32[64,32], index: 7, kind: input, shape index: {}]   ;;  %s414_s6 = inlined_call_operand.vmem [shape: f32[1,64], index: 6, kind: input, shape index: {}]   ;;  %s415_s2 = inlined_call_operand.vmem [shape: f32[1,128], index: 2, kind: input, shape index: {}]   ;;  %s416_s8 = inlined_call_operand.vmem [shape: f32[1,32], index: 8, kind: input, shape index: {}]   ;;  %s417_s9 = inlined_call_operand.vmem [shape: f32[1,32], index: 9, kind: input, shape index: {}]   ;;  %s418_s10 = inlined_call_operand.<no memory space> [shape: f32[1,1], index: 10, kind: input, shape index: {}]   ;;  %s419_s11 = inlined_call_operand.vmem [shape: f32[8,1], index: 11, kind: output, shape index: {}]  }
   0x1   :  { %v42_v0 = vld [vmem:[%s408_s1 + $0x8] sm:$0xff]  ;;  %v41_v1 = vld [vmem:[%s408_s1] sm:$0xff]  ;;  %v121_v3 = vld [vmem:[%s411_s4 + $0x78] sm:$0xff]  ;;  %vm225_vm7 = vcmask 7168  }
   0x2   :  { %v40_v2 = vld [vmem:[%s409_s0] sm:$0xff]  ;;  %61 = vmatpush.msra.mxu0 %v42_v0  ;;  %148 = vmatpush.msra.mxu2 %v121_v3  ;;  %v120_v6 = vld [vmem:[%s411_s4 + $0x70] sm:$0xff]  ;;  %v119_v8 = vld [vmem:[%s411_s4 + $0x68] sm:$0xff]  ;;  %v16_v3 = vstv %s418_s10 }
   0x3   :  { %123 = vrot.lane.b32.xlu0 %v40_v2, %s242_s23  ;;  %v118_v10 = vld [vmem:[%s411_s4 + $0x60] sm:$0xff]  ;;  %v117_v12 = vld [vmem:[%s411_s4 + $0x58] sm:$0xff]  ;;  %v116_v14 = vld [vmem:[%s411_s4 + $0x50] sm:$0xff]  ;;  %17 = vst [vmem:[#allocation2] sm:$0x1] %v16_v3 }
   0x4   :  { %62 = vmatpush.msra.mxu0 %v41_v1  ;;  %149 = vmatpush.msra.mxu2 %v120_v6  ;;  %v115_v16 = vld [vmem:[%s411_s4 + $0x48] sm:$0xff]  ;;  %v114_v18 = vld [vmem:[%s411_s4 + $0x40] sm:$0xff]  ;;  %v113_v20 = vld [vmem:[%s411_s4 + $0x38] sm:$0xff] }
   0x5   :  { %231 = vmatmul.msk.f32.vlgmr.msra.gmra.mxu0 %vm43_vm0, %v40_v2  ;;  %v112_v22 = vld [vmem:[%s411_s4 + $0x30] sm:$0xff]  ;;  %v111_v24 = vld [vmem:[%s411_s4 + $0x28] sm:$0xff]  ;;  %v110_v26 = vld [vmem:[%s411_s4 + $0x20] sm:$0xff] }
   0x6   :  { %150 = vmatpush.msra.mxu2 %v119_v8  ;;  %v109_v28 = vld [vmem:[%s411_s4 + $0x18] sm:$0xff]  ;;  %v108_v30 = vld [vmem:[%s411_s4 + $0x10] sm:$0xff]  ;;  %v107_v31 = vld [vmem:[%s411_s4 + $0x8] sm:$0xff] }
   0x7   :  { %v106_v33 = vld [vmem:[%s411_s4] sm:$0xff]  ;;  %v181_v38 = vld [vmem:[%s413_s7 + $0x38] sm:$0xff]  ;;  %v180_v39 = vld [vmem:[%s413_s7 + $0x30] sm:$0xff] }
   0x8   :  { %151 = vmatpush.msra.mxu2 %v118_v10  ;;  %v122_v36 = vld [vmem:[%s412_s5] sm:$0xff]  ;;  %198 = vmatpush.msra.mxu3 %v181_v38  ;;  %v179_v41 = vld [vmem:[%s413_s7 + $0x28] sm:$0xff]  ;;  %v177_v57 = vld [vmem:[%s413_s7 + $0x18] sm:$0xff] }
   0x9   :  { %143 = vmatpush.msra.mxu1 %v122_v36  ;;  %v178_v42 = vld [vmem:[%s413_s7 + $0x20] sm:$0xff]  ;;  %v176_v58 = vld [vmem:[%s413_s7 + $0x10] sm:$0xff]  ;;  %v175_v59 = vld [vmem:[%s413_s7 + $0x8] sm:$0xff] }
   0xa   :  { %152 = vmatpush.msra.mxu2 %v117_v12  ;;  %199 = vmatpush.msra.mxu3 %v180_v39  ;;  %v83_v48 = vld [vmem:[%s415_s2] sm:$0x1] }
   0xb   :  { %v235_v53 = vld [vmem:[%s410_s3] ss:$0 sm:$0xff] }
   0xc   :  { %153 = vmatpush.msra.mxu2 %v116_v14  ;;  %200 = vmatpush.msra.mxu3 %v179_v41  ;;  %v174_v60 = vld [vmem:[%s413_s7] sm:$0xff] }
   0xd   :  { %v236_v62 = vld [vmem:[%s414_s6] ss:$0 sm:$0xff] }
   0xe   :  { %154 = vmatpush.msra.mxu2 %v115_v16  ;;  %201 = vmatpush.msra.mxu3 %v178_v42 }
  0x10   :  { %155 = vmatpush.msra.mxu2 %v114_v18  ;;  %202 = vmatpush.msra.mxu3 %v177_v57 }
  0x12   :  { %156 = vmatpush.msra.mxu2 %v113_v20  ;;  %203 = vmatpush.msra.mxu3 %v176_v58 }
  0x14   :  { %157 = vmatpush.msra.mxu2 %v112_v22  ;;  %204 = vmatpush.msra.mxu3 %v175_v59 }
  0x16   :  { %158 = vmatpush.msra.mxu2 %v111_v24  ;;  %205 = vmatpush.msra.mxu3 %v174_v60 }
  0x18   :  { %159 = vmatpush.msra.mxu2 %v110_v26 }
  0x1a   :  { %160 = vmatpush.msra.mxu2 %v109_v28 }
  0x1c   :  { %161 = vmatpush.msra.mxu2 %v108_v30 }
  0x1e   :  { %162 = vmatpush.msra.mxu2 %v107_v31 }
  0x20   :  { %163 = vmatpush.msra.mxu2 %v106_v33 }
  0x75   :  { %v124_v37 = vpop.permute.xlu0 %123 }
  0x76   :  { %232 = vmatmul.msk.f32.vlgmr.msra.gmra.mxu1 %vm125_vm1, %v124_v37 }
  0x82   :  { %v64_v4 = vpop.f32.mrf.mxu0 }
  0x83   :  { %v67_v5 = vrot.slane %v64_v4, 4 }
  0x85   :  { %v68_v7 = vadd.f32 %v67_v5, %v64_v4 }
  0x87   :  { %v69_v9 = vrot.slane %v68_v7, 2 }
  0x89   :  { %v70_v11 = vadd.f32 %v69_v9, %v68_v7  ;;  %v238_v7 = vld [vmem:[%s417_s9] ss:$0 sm:$0xff] }
  0x8b   :  { %v71_v13 = vrot.slane %v70_v11, 1 }
  0x8d   :  { %v72_v15 = vadd.f32 %v71_v13, %v70_v11  ;;  %v239_v11 = vld [vmem:[#allocation2] ss:$0 sm:$0xff] }
  0x8f   :  { %v73_v17 = vmul.f32 0.125, %v72_v15 }
  0x91   :  { %v74_v19 = vsub.f32 %v64_v4, %v73_v17  ;;  %v237_v4 = vld [vmem:[%s416_s8] ss:$0 sm:$0xff] }
  0x93   :  { %v75_v21 = vmul.f32 %v74_v19, %v74_v19 }
  0x95   :  { %v76_v23 = vrot.slane %v75_v21, 4 }
  0x97   :  { %v77_v25 = vadd.f32 %v76_v23, %v75_v21 }
  0x99   :  { %v78_v27 = vrot.slane %v77_v25, 2 }
  0x9b   :  { %v79_v29 = vadd.f32 %v78_v27, %v77_v25 }
  0x9d   :  { %v80_v32 = vrot.slane %v79_v29, 1 }
  0x9f   :  { %v81_v34 = vadd.f32 %v80_v32, %v79_v29 }
  0xa1   :  { %v82_v35 = vmul.f32 0.125, %v81_v34 }
  0xa3   :  { %v84_v40 = vadd.f32 1e-05, %v82_v35 }
  0xa5   :  { %240 = vrsqrt.f32 %v84_v40  ;;  %vm91_vm3 = vweird.f32 %v84_v40 }
  0xab   :  { %v241_v43 = vpop.eup %240 }
  0xac   :  { %v86_v44 = vmul.f32 %v241_v43, %v84_v40  ;;  %vm92_vm2 = vweird.f32 %v241_v43 }
  0xad   :  { %vm93_vm4 = vmor %vm91_vm3, %vm92_vm2 }
  0xae   :  { %v87_v45 = vmul.f32 %v241_v43, %v86_v44 }
  0xb0   :  { %v88_v46 = vmul.f32 0.5, %v87_v45 }
  0xb2   :  { %v89_v47 = vsub.f32 1.5, %v88_v46 }
  0xb4   :  { %v90_v49 = vmul.f32 %v241_v43, %v89_v47 }
  0xb6   :  { %v94_v50 = vsel %vm93_vm4, %v241_v43, %v90_v49 }
  0xb7   :  { %v95_v51 = vmul.f32 %v94_v50, %v83_v48 }
  0xb9   :  { %v97_v52 = vperm.slane %v95_v51, 0 }
  0xbb   :  { %v99_v54 = vmul.f32 %v97_v52, %v74_v19 }
  0xbd   :  { %v104_v55 = vadd.f32 %v235_v53, %v99_v54 }
  0xbf   :  { %v105_v56 = vmax.f32 %v104_v55, 0.0 }
  0xc1   :  { %164 = vmatmul.f32.vlgmr.msra.gmra.mxu2 %v105_v56 }
  0xf3   :  { %v145_v61 = vpop.f32.mrf.mxu1 }
 0x144   :  { %v165_v63 = vpop.f32.mrf.mxu2 }
 0x145   :  { %v166_v0 = vadd.f32 %v165_v63, %v145_v61 }
 0x147   :  { %v172_v1 = vadd.f32 %v236_v62, %v166_v0 }
 0x149   :  { %v173_v2 = vmax.f32 %v172_v1, 0.0 }
 0x14b   :  { %233 = vmatmul.msk.f32.vlgmr.msra.gmra.mxu3 %vm186_vm5, %v173_v2 }
 0x1ce   :  { %v207_v5 = vpop.f32.mrf.mxu3 }
 0x1cf   :  { %v208_v6 = vadd.f32 %v237_v4, %v207_v5 }
 0x1d1   :  { %v210_v8 = vmax.f32 %v208_v6, 0.0 }
 0x1d3   :  { %v215_v9 = vmul.f32 %v238_v7, %v210_v8 }
 0x1d5   :  { %v217_v10 = vsel %vm216_vm6, %v215_v9, 0.0 }
 0x1d6   :  { %218 = vadd.xlane.f32.xlu0 %v217_v10 }
 0x249   :  { %v219_v12 = vpop.xlane.xlu0 %218 }
 0x24a   :  { %v224_v13 = vadd.f32 %v239_v11, %v219_v12 }
 0x24c   :  { %226 = vst.msk [vmem:[%s419_s11] sm:$0xff] %vm225_vm7, %v224_v13 }

</bundles_post_ra>
